<compile_context>
chip_gen: v7x
topology: tpu7x:2x2x1
jax: 0.10.0
libtpu: 0.0.40
codegen_flags: <defaults>
</compile_context>

<pallas_src>
import jax
import jax.numpy as jnp
import numpy as np
from jax.experimental import pallas as pl
from jax.experimental.pallas import tpu as pltpu

EPS = 1e-5
OUT_PAD = 128                # pad num_classes up to a dense, unmasked 128-lane store
MXU_DTYPE = jnp.float32      # jnp.bfloat16 on v6e/v7x for ~2x MXU rate (acc stays f32)


# ------------------------------ Pallas kernel ------------------------------- #

def fused_cnn_kernel(x_ref, w1_ref, b1_ref, w2_ref, b2_ref,
                     wfc1_ref, bfc1_ref, wfc2_ref, bfc2_ref, o_ref):
    """Whole CNNModel forward, batch-major, fully VMEM resident, 4 matmuls.

    x_ref   : (B, L)          raw input (channels == 1).
    w1_ref  : (L, L*16)       BN1-folded conv1 as a block-banded matrix.
    b1_ref  : (1, L*16)       conv1+BN1 bias tiled over positions.
    w2_ref  : (L*16, L*32)    BN2-folded conv2 as a block-banded matrix.
    b2_ref  : (1, L*32)
    wfc1_ref: (L*32, 128)     fc1 weight, pre-permuted to the h2-slab lane order.
    bfc1_ref: (1, 128)
    wfc2_ref: (128, OUT_PAD)  fc2 weight, zero-padded along output lanes.
    bfc2_ref: (1, OUT_PAD)
    o_ref   : (B, OUT_PAD)    padded logits (dense 128-lane store).
    """
    # conv1 + BN1 + ReLU  (zero padding is encoded in the banded weight matrix)
    x = x_ref[...].astype(w1_ref.dtype)
    h1 = jnp.maximum(
        jnp.dot(x, w1_ref[...], preferred_element_type=jnp.float32) + b1_ref[...],
        0.0)                                                    # (B, L*16)

    # conv2 + BN2 + ReLU
    h2 = jnp.maximum(
        jnp.dot(h1.astype(w2_ref.dtype), w2_ref[...],
                preferred_element_type=jnp.float32) + b2_ref[...],
        0.0)                                                    # (B, L*32)

    # flatten (already in PyTorch's c*L+l order via the pre-permuted Wfc1) + fc1 + ReLU
    h3 = jnp.maximum(
        jnp.dot(h2.astype(wfc1_ref.dtype), wfc1_ref[...],
                preferred_element_type=jnp.float32) + bfc1_ref[...],
        0.0)                                                    # (B, 128)

    # TODO(synk): Dropout(p=0.5) is identity in eval mode; training-mode RNG
    # masking not implemented.
    o_ref[...] = (jnp.dot(h3.astype(wfc2_ref.dtype), wfc2_ref[...],
                          preferred_element_type=jnp.float32) + bfc2_ref[...])


# ------------------------- Parameter prep (one-time) ------------------------- #

def prepare_params(p):
    """Fold BN into convs, turn both convs into block-banded matrices, permute
    and pad the FC weights.  Runs once, outside jit."""
    f32 = jnp.float32
    hidden = p["fc1_w"].shape[0]                                     # 128
    num_classes = p["fc2_w"].shape[0]
    c1 = p["conv1_w"].shape[0]                                       # 16
    c2 = p["conv2_w"].shape[0]                                       # 32
    L = p["fc1_w"].shape[1] // c2                                    # num_features
    assert num_classes <= OUT_PAD

    # --- eval-mode BN fold: w' = w * g * rsqrt(v+eps);  b' = (b - m)*s + beta ---
    s1 = p["bn1_g"] * jax.lax.rsqrt(p["bn1_v"] + EPS)                # (16,)
    w1f = (p["conv1_w"][:, 0, :] * s1[:, None]).T.astype(f32)        # (3, 16)  [k, c]
    b1f = ((p["conv1_b"] - p["bn1_m"]) * s1 + p["bn1_b"]).astype(f32)

    s2 = p["bn2_g"] * jax.lax.rsqrt(p["bn2_v"] + EPS)                # (32,)
    w2f = jnp.transpose(p["conv2_w"] * s2[:, None, None],
                        (2, 1, 0)).astype(f32)                       # (3,16,32) [k,ci,co]
    b2f = ((p["conv2_b"] - p["bn2_m"]) * s2 + p["bn2_b"]).astype(f32)

    # --- shift matrices: S[k, l_in, l_out] = 1  iff  l_in == l_out + k - 1 ---
    # (encodes kernel_size=3, padding=1 "same" zero padding: out-of-range taps
    #  simply have no row, so they contribute zero.)
    S = jnp.stack([jnp.eye(L, L, k=1 - t, dtype=f32) for t in range(3)])  # (3,L,L)

    # conv1 as (L, L*16):  W1[l_in, l_out*16 + c] = w1f[k, c] with l_in = l_out+k-1
    w1_big = jnp.einsum("kpl,kc->plc", S, w1f).reshape(L, L * c1)
    b1_row = jnp.tile(b1f, (L,))[None, :]                             # (1, L*16)

    # conv2 as (L*16, L*32): W2[p*16+ci, l*32+co] = w2f[k, ci, co] with p = l+k-1
    w2_big = jnp.einsum("kpl,kio->pilo", S, w2f).reshape(L * c1, L * c2)
    b2_row = jnp.tile(b2f, (L,))[None, :]                             # (1, L*32)

    # fc1: PyTorch flattens (B, 32, L) with index c*L + l; our h2 slab uses
    # lane index l*32 + c  ->  pre-permute to (L*32, hidden).
    wfc1 = (p["fc1_w"].reshape(hidden, c2, L)
            .transpose(2, 1, 0).reshape(L * c2, hidden)).astype(f32)  # (512, 128)
    bfc1 = p["fc1_b"][None, :].astype(f32)                            # (1, 128)

    # fc2: zero-pad output lanes to OUT_PAD for a dense 128-lane store.
    wfc2 = jnp.pad(p["fc2_w"].T.astype(f32),
                   ((0, 0), (0, OUT_PAD - num_classes)))              # (128, OUT_PAD)
    bfc2 = jnp.pad(p["fc2_b"].astype(f32),
                   (0, OUT_PAD - num_classes))[None, :]                # (1, OUT_PAD)

    return dict(w1=w1_big.astype(MXU_DTYPE), b1=b1_row,
                w2=w2_big.astype(MXU_DTYPE), b2=b2_row,
                wfc1=wfc1.astype(MXU_DTYPE), bfc1=bfc1,
                wfc2=wfc2.astype(MXU_DTYPE), bfc2=bfc2)


# ------------------------------ Forward (glue) ------------------------------- #

def _vmem():
    return pl.BlockSpec(memory_space=pltpu.MemorySpace.VMEM)


def cnn_forward(x, prep):
    """x: (B, 1, L) NCW like PyTorch.  Returns (B, OUT_PAD) padded logits;
    lanes >= num_classes are exact zeros -> slice lazily downstream."""
    B, _, L = x.shape
    x2d = x.reshape(B, L)   # squeeze of a size-1 dim: free bitcast, no data movement

    # For large batches: add grid=(B//tb,) with batch-tiled BlockSpecs and
    # dimension_semantics=("parallel",) (v7x: 2 TCs, 64 MiB VMEM budget).
    return pl.pallas_call(
        fused_cnn_kernel,
        out_shape=jax.ShapeDtypeStruct((B, OUT_PAD), jnp.float32),
        in_specs=[_vmem()] * 9,
        out_specs=_vmem(),
    )(x2d, prep["w1"], prep["b1"], prep["w2"], prep["b2"],
      prep["wfc1"], prep["bfc1"], prep["wfc2"], prep["bfc2"])


# ----------------------------- Pure-JAX reference --------------------------- #

def reference_forward(x, p):
    def bn(y, g, b, m, v):
        return (y - m[None, :, None]) * jax.lax.rsqrt(v[None, :, None] + EPS) \
               * g[None, :, None] + b[None, :, None]

    dn = ("NCH", "OIH", "NCH")
    y = jax.lax.conv_general_dilated(x, p["conv1_w"], (1,), [(1, 1)],
                                     dimension_numbers=dn) + p["conv1_b"][None, :, None]
    y = jnp.maximum(bn(y, p["bn1_g"], p["bn1_b"], p["bn1_m"], p["bn1_v"]), 0.0)
    y = jax.lax.conv_general_dilated(y, p["conv2_w"], (1,), [(1, 1)],
                                     dimension_numbers=dn) + p["conv2_b"][None, :, None]
    y = jnp.maximum(bn(y, p["bn2_g"], p["bn2_b"], p["bn2_m"], p["bn2_v"]), 0.0)
    y = y.reshape(y.shape[0], -1)
    y = jnp.maximum(y @ p["fc1_w"].T + p["fc1_b"], 0.0)
    return y @ p["fc2_w"].T + p["fc2_b"]


# ---------------------------------- Main ------------------------------------ #

def make_params(key, num_features, num_classes):
    ks = jax.random.split(key, 10)
    f32 = jnp.float32
    return {
        "conv1_w": 0.1 * jax.random.normal(ks[0], (16, 1, 3), f32),
        "conv1_b": 0.1 * jax.random.normal(ks[1], (16,), f32),
        "bn1_g": 1.0 + 0.1 * jax.random.normal(ks[2], (16,), f32),
        "bn1_b": 0.1 * jax.random.normal(ks[3], (16,), f32),
        "bn1_m": jnp.zeros((16,), f32),
        "bn1_v": jnp.ones((16,), f32),
        "conv2_w": 0.1 * jax.random.normal(ks[4], (32, 16, 3), f32),
        "conv2_b": 0.1 * jax.random.normal(ks[5], (32,), f32),
        "bn2_g": 1.0 + 0.1 * jax.random.normal(ks[6], (32,), f32),
        "bn2_b": 0.1 * jax.random.normal(ks[7], (32,), f32),
        "bn2_m": jnp.zeros((32,), f32),
        "bn2_v": jnp.ones((32,), f32),
        "fc1_w": 0.05 * jax.random.normal(ks[8], (128, num_features * 32), f32),
        "fc1_b": jnp.zeros((128,), f32),
        "fc2_w": 0.05 * jax.random.normal(ks[9], (num_classes, 128), f32),
        "fc2_b": jnp.zeros((num_classes,), f32),
    }


if __name__ == "__main__":
    B, num_features, num_classes = 2, 16, 4
    key = jax.random.PRNGKey(0)
    kx, kp = jax.random.split(key)
    x = jax.random.normal(kx, (B, 1, num_features), jnp.float32)   # NCW, like PyTorch
    params = make_params(kp, num_features, num_classes)

    prep = prepare_params(params)          # one-time: BN fold + banded conv matrices
    fwd = jax.jit(cnn_forward)

    out_pad = jax.block_until_ready(fwd(x, prep))                  # (B, OUT_PAD)
    out = np.asarray(out_pad)[:, :num_classes]                     # lazy slice, outside jit
    ref = np.asarray(jax.block_until_ready(reference_forward(x, params)))
    np.testing.assert_allclose(out, ref, rtol=1e-3, atol=1e-3)

    print("KERNEL_OK")
</pallas_src>

<mosaic_0001>
module attributes {stable_mosaic.version = 11 : i64} {
  func.func @fused_cnn_kernel(%arg0: memref<2x16xf32, #tpu.memory_space<vmem>>, %arg1: memref<16x256xf32, #tpu.memory_space<vmem>>, %arg2: memref<1x256xf32, #tpu.memory_space<vmem>>, %arg3: memref<256x512xf32, #tpu.memory_space<vmem>>, %arg4: memref<1x512xf32, #tpu.memory_space<vmem>>, %arg5: memref<512x128xf32, #tpu.memory_space<vmem>>, %arg6: memref<1x128xf32, #tpu.memory_space<vmem>>, %arg7: memref<128x128xf32, #tpu.memory_space<vmem>>, %arg8: memref<1x128xf32, #tpu.memory_space<vmem>>, %arg9: memref<2x128xf32, #tpu.memory_space<vmem>>) attributes {dimension_semantics = [], scalar_prefetch = 0 : i64, scratch_operands = 0 : i64, tpu.core_type = #tpu.core_type<tc>} {
    %c0 = arith.constant 0 : index
    %c0_0 = arith.constant 0 : index
    %0 = vector.load %arg0[%c0, %c0_0] : memref<2x16xf32, #tpu.memory_space<vmem>>, vector<2x16xf32>
    %c0_1 = arith.constant 0 : index
    %c0_2 = arith.constant 0 : index
    %1 = vector.load %arg1[%c0_1, %c0_2] : memref<16x256xf32, #tpu.memory_space<vmem>>, vector<16x256xf32>
    %cst = arith.constant dense<0.000000e+00> : vector<2x256xf32>
    %2 = tpu.matmul %0, %1, %cst {dimension_numbers = #tpu.dot_dimension_numbers<[1], [0], [0], [1], [0, 0, 1, 1], [], []>} : vector<2x16xf32>, vector<16x256xf32>, vector<2x256xf32> -> vector<2x256xf32>
    %c0_3 = arith.constant 0 : index
    %c0_4 = arith.constant 0 : index
    %3 = vector.load %arg2[%c0_3, %c0_4] : memref<1x256xf32, #tpu.memory_space<vmem>>, vector<1x256xf32>
    %4 = vector.broadcast %3 : vector<1x256xf32> to vector<2x256xf32>
    %5 = arith.addf %2, %4 : vector<2x256xf32>
    %cst_5 = arith.constant 0.000000e+00 : f32
    %6 = vector.broadcast %cst_5 : f32 to vector<2x256xf32>
    %7 = arith.maximumf %5, %6 : vector<2x256xf32>
    %c0_6 = arith.constant 0 : index
    %c0_7 = arith.constant 0 : index
    %8 = vector.load %arg3[%c0_6, %c0_7] : memref<256x512xf32, #tpu.memory_space<vmem>>, vector<256x512xf32>
    %cst_8 = arith.constant dense<0.000000e+00> : vector<2x512xf32>
    %9 = tpu.matmul %7, %8, %cst_8 {dimension_numbers = #tpu.dot_dimension_numbers<[1], [0], [0], [1], [0, 0, 1, 1], [], []>} : vector<2x256xf32>, vector<256x512xf32>, vector<2x512xf32> -> vector<2x512xf32>
    %c0_9 = arith.constant 0 : index
    %c0_10 = arith.constant 0 : index
    %10 = vector.load %arg4[%c0_9, %c0_10] : memref<1x512xf32, #tpu.memory_space<vmem>>, vector<1x512xf32>
    %11 = vector.broadcast %10 : vector<1x512xf32> to vector<2x512xf32>
    %12 = arith.addf %9, %11 : vector<2x512xf32>
    %cst_11 = arith.constant 0.000000e+00 : f32
    %13 = vector.broadcast %cst_11 : f32 to vector<2x512xf32>
    %14 = arith.maximumf %12, %13 : vector<2x512xf32>
    %c0_12 = arith.constant 0 : index
    %c0_13 = arith.constant 0 : index
    %15 = vector.load %arg5[%c0_12, %c0_13] : memref<512x128xf32, #tpu.memory_space<vmem>>, vector<512x128xf32>
    %cst_14 = arith.constant dense<0.000000e+00> : vector<2x128xf32>
    %16 = tpu.matmul %14, %15, %cst_14 {dimension_numbers = #tpu.dot_dimension_numbers<[1], [0], [0], [1], [0, 0, 1, 1], [], []>} : vector<2x512xf32>, vector<512x128xf32>, vector<2x128xf32> -> vector<2x128xf32>
    %c0_15 = arith.constant 0 : index
    %c0_16 = arith.constant 0 : index
    %17 = vector.load %arg6[%c0_15, %c0_16] : memref<1x128xf32, #tpu.memory_space<vmem>>, vector<1x128xf32>
    %18 = vector.broadcast %17 : vector<1x128xf32> to vector<2x128xf32>
    %19 = arith.addf %16, %18 : vector<2x128xf32>
    %cst_17 = arith.constant 0.000000e+00 : f32
    %20 = vector.broadcast %cst_17 : f32 to vector<2x128xf32>
    %21 = arith.maximumf %19, %20 : vector<2x128xf32>
    %c0_18 = arith.constant 0 : index
    %c0_19 = arith.constant 0 : index
    %22 = vector.load %arg7[%c0_18, %c0_19] : memref<128x128xf32, #tpu.memory_space<vmem>>, vector<128x128xf32>
    %cst_20 = arith.constant dense<0.000000e+00> : vector<2x128xf32>
    %23 = tpu.matmul %21, %22, %cst_20 {dimension_numbers = #tpu.dot_dimension_numbers<[1], [0], [0], [1], [0, 0, 1, 1], [], []>} : vector<2x128xf32>, vector<128x128xf32>, vector<2x128xf32> -> vector<2x128xf32>
    %c0_21 = arith.constant 0 : index
    %c0_22 = arith.constant 0 : index
    %24 = vector.load %arg8[%c0_21, %c0_22] : memref<1x128xf32, #tpu.memory_space<vmem>>, vector<1x128xf32>
    %25 = vector.broadcast %24 : vector<1x128xf32> to vector<2x128xf32>
    %26 = arith.addf %23, %25 : vector<2x128xf32>
    %c0_23 = arith.constant 0 : index
    %c0_24 = arith.constant 0 : index
    %27 = vector.load %arg9[%c0_23, %c0_24] : memref<2x128xf32, #tpu.memory_space<vmem>>, vector<2x128xf32>
    tpu.vector_store %arg9[%c0_23, %c0_24], %26 {strides = array<i32>} : memref<2x128xf32, #tpu.memory_space<vmem>>, vector<2x128xf32>,
    return
  }
}

</mosaic_0001>

<bundles_post_ra>
// kernel: cnn_forward.1
= control target key start
LH: loop header
LB: loop body
LE: loop exit
PB: predicated region body
PF: predicated region fallthrough
CT: control target
= control target key end

     0   :  { %14 = vsyncpa [#allocation3], 0  ;;  %s1491_s0 = inlined_call_operand.vmem [shape: f32[2,16], index: 0, kind: input, shape index: {}]   ;;  %s1492_s1 = inlined_call_operand.hbm [shape: f32[16,256], index: 1, kind: input, shape index: {}]   ;;  %s1493_s2 = inlined_call_operand.hbm [shape: f32[1,256], index: 2, kind: input, shape index: {}]   ;;  %s1494_s3 = inlined_call_operand.hbm [shape: f32[256,512], index: 3, kind: input, shape index: {}]   ;;  %s1495_s4 = inlined_call_operand.vmem [shape: f32[1,512], index: 4, kind: input, shape index: {}]   ;;  %s1496_s5 = inlined_call_operand.hbm [shape: f32[512,128], index: 5, kind: input, shape index: {}]   ;;  %s1497_s6 = inlined_call_operand.vmem [shape: f32[1,128], index: 6, kind: input, shape index: {}]   ;;  %s1498_s7 = inlined_call_operand.hbm [shape: f32[128,128], index: 7, kind: input, shape index: {}]   ;;  %s1499_s8 = inlined_call_operand.vmem [shape: f32[1,128], index: 8, kind: input, shape index: {}]   ;;  %s1500_s9 = inlined_call_operand.hbm [shape: f32[2,128], index: 9, kind: output, shape index: {}]  }
   0x1   :  { %15 = vsyncpa [#allocation6], 0 }
   0x2   :  { %16 = vsyncpa [#allocation9], 0 }
   0x3   :  { %17 = vsyncpa [#allocation4], 0  ;;  %s1312_s30 = smov [#allocation5]   ;;  %s1313_s11 = smov [#allocation8]  }
   0x4   :  { %s38_s10 = sshll.u32 %s1312_s30, 4  ;;  %s61_s12 = sshll.u32 %s1313_s11, 4  ;;  %s39_s10 = int_to_ptr.vmem [resolvable:$true] %s38_s10  ;;  %s1377_s12 = int_to_ptr.vmem [resolvable:$true] %s61_s12 }
   0x5   :  { %s1172_s15 = scalar_lea.hbm %s1493_s2, 32 }
   0x6   :  { %p1173_p0 = scmp.ne.s32.totalorder %s1493_s2, %s1172_s15  ;;  %p1176_p1 = scmp.lt.u32.totalorder %s1172_s15, %s1493_s2 }
   0x8   :  { %p1178_p2 = pnand %p1176_p1, %p1173_p0 }
   0xa   :  { %1181 = shalt.err (!%p1178_p2)
}
   0xb   :  { %s1182_s20 = scalar_lea.vmem %s39_s10, 32  ;;  %p1187_p4 = scmp.lt.s32.totalorder %s39_s10, %s39_s10 }
   0xc   :  { %p1183_p3 = scmp.ne.s32.totalorder %s39_s10, %s1182_s20  ;;  %p1188_p5 = scmp.lt.s32.totalorder %s1182_s20, %s1182_s20 }
   0xe   :  { %p1189_p6 = por %p1188_p5, %p1187_p4 }
  0x10   :  { %p1190_p7 = pnand %p1189_p6, %p1183_p3 }
  0x12   :  { %1193 = shalt.err (!%p1190_p7)
}
  0x13   :  { %41 = dma.hbm_to_vmem [thread:$0]  %s1493_s2, 32, %s39_s10, [#allocation6]  }
  0x14   :  { %s1194_s25 = scalar_lea.hbm %s1496_s5, 8192 }
  0x15   :  { %p1195_p8 = scmp.ne.s32.totalorder %s1496_s5, %s1194_s25  ;;  %p1198_p9 = scmp.lt.u32.totalorder %s1194_s25, %s1496_s5 }
  0x17   :  { %p1200_p10 = pnand %p1198_p9, %p1195_p8 }
  0x19   :  { %1203 = shalt.err (!%p1200_p10)
}
  0x1a   :  { %s1204_s30 = scalar_lea.vmem %s1377_s12, 8192  ;;  %p1209_p12 = scmp.lt.s32.totalorder %s1377_s12, %s1377_s12 }
  0x1b   :  { %p1205_p11 = scmp.ne.s32.totalorder %s1377_s12, %s1204_s30  ;;  %p1210_p13 = scmp.lt.s32.totalorder %s1204_s30, %s1204_s30 }
  0x1d   :  { %p1211_p0 = por %p1210_p13, %p1209_p12 }
  0x1f   :  { %p1212_p1 = pnand %p1211_p0, %p1205_p11 }
  0x21   :  { %1215 = shalt.err (!%p1212_p1)
}
  0x22   :  { %s1314_s2 = smov 128   ;;  %s1315_s10 = smov 8  }
  0x23   :  { %67 = dma.hbm_to_vmem [thread:$0]  %s1496_s5, 8192, %s1377_s12, [#allocation9], %s1314_s2, %s1314_s2, %s1315_s10  }
  0x24   :  { %s1316_s14 = smov [#allocation2]   ;;  %s1216_s18 = scalar_lea.hbm %s1492_s1, 512 }
  0x25   :  { %s25_s15 = sshll.u32 %s1316_s14, 4  ;;  %p1217_p2 = scmp.ne.s32.totalorder %s1492_s1, %s1216_s18  ;;  %s26_s15 = int_to_ptr.vmem [resolvable:$true] %s25_s15 }
  0x26   :  { %p1220_p3 = scmp.lt.u32.totalorder %s1216_s18, %s1492_s1 }
  0x28   :  { %p1222_p4 = pnand %p1220_p3, %p1217_p2 }
  0x2a   :  { %1225 = shalt.err (!%p1222_p4)
}
  0x2b   :  { %s1226_s23 = scalar_lea.vmem %s26_s15, 512  ;;  %p1231_p6 = scmp.lt.s32.totalorder %s26_s15, %s26_s15 }
  0x2c   :  { %p1227_p5 = scmp.ne.s32.totalorder %s26_s15, %s1226_s23  ;;  %p1232_p7 = scmp.lt.s32.totalorder %s1226_s23, %s1226_s23 }
  0x2e   :  { %p1233_p8 = por %p1232_p7, %p1231_p6 }
  0x30   :  { %p1234_p9 = pnand %p1233_p8, %p1227_p5 }
  0x32   :  { %1237 = shalt.err (!%p1234_p9)
}
  0x33   :  { %s1317_s5 = smov 256   ;;  %s1318_s12 = smov 16  }
  0x34   :  { %31 = dma.hbm_to_vmem [thread:$0]  %s1492_s1, 512, %s26_s15, [#allocation3], %s1317_s5, %s1317_s5, %s1318_s12  }
  0x35   :  { %s1319_s26 = smov [#allocation7]   ;;  %s1238_s30 = scalar_lea.hbm %s1494_s3, 16384 }
  0x36   :  { %s47_s27 = sshll.u32 %s1319_s26, 4  ;;  %p1239_p10 = scmp.ne.s32.totalorder %s1494_s3, %s1238_s30  ;;  %s48_s27 = int_to_ptr.vmem [resolvable:$true] %s47_s27 }
  0x37   :  { %p1242_p11 = scmp.lt.u32.totalorder %s1238_s30, %s1494_s3 }
  0x39   :  { %p1244_p12 = pnand %p1242_p11, %p1239_p10 }
  0x3b   :  { %1247 = shalt.err (!%p1244_p12)
}
  0x3c   :  { %s1248_s17 = scalar_lea.vmem %s48_s27, 16384  ;;  %p1253_p0 = scmp.lt.s32.totalorder %s48_s27, %s48_s27 }
  0x3d   :  { %p1249_p13 = scmp.ne.s32.totalorder %s48_s27, %s1248_s17  ;;  %p1254_p1 = scmp.lt.s32.totalorder %s1248_s17, %s1248_s17 }
  0x3f   :  { %p1255_p2 = por %p1254_p1, %p1253_p0 }
  0x41   :  { %p1256_p3 = pnand %p1255_p2, %p1249_p13 }
  0x43   :  { %1259 = shalt.err (!%p1256_p3)
}
  0x44   :  { %s1320_s1 = smov 512   ;;  %s1321_s15 = smov 32  }
  0x45   :  { %53 = dma.hbm_to_vmem [thread:$0]  %s1494_s3, 16384, %s48_s27, [#allocation6], %s1320_s1, %s1320_s1, %s1321_s15  }
  0x46   :  { %s1322_s20 = smov [#allocation10]   ;;  %s1260_s5 = scalar_lea.hbm %s1498_s7, 2048 }
  0x47   :  { %s75_s21 = sshll.u32 %s1322_s20, 4  ;;  %p1261_p4 = scmp.ne.s32.totalorder %s1498_s7, %s1260_s5  ;;  %s76_s21 = int_to_ptr.vmem [resolvable:$true] %s75_s21 }
  0x48   :  { %p1264_p5 = scmp.lt.u32.totalorder %s1260_s5, %s1498_s7 }
  0x4a   :  { %p1266_p6 = pnand %p1264_p5, %p1261_p4 }
  0x4c   :  { %1269 = shalt.err (!%p1266_p6)
}
  0x4d   :  { %s1270_s28 = scalar_lea.vmem %s76_s21, 2048  ;;  %p1275_p8 = scmp.lt.s32.totalorder %s76_s21, %s76_s21 }
  0x4e   :  { %p1271_p7 = scmp.ne.s32.totalorder %s76_s21, %s1270_s28  ;;  %p1276_p9 = scmp.lt.s32.totalorder %s1270_s28, %s1270_s28 }
  0x50   :  { %p1277_p10 = por %p1276_p9, %p1275_p8 }
  0x52   :  { %p1278_p11 = pnand %p1277_p10, %p1271_p7 }
  0x54   :  { %1281 = shalt.err (!%p1278_p11)
}
  0x55   :  { %81 = dma.hbm_to_vmem [thread:$0]  %s1498_s7, 2048, %s76_s21, [#allocation9], %s1314_s2, %s1314_s2, %s1315_s10  }
  0x56   :  { %1304 = dma.done.wait [#allocation3], 512  }
  0x57   :  { %1305 = vsyncadd [#allocation3], 4294966784 }
  0x58   :  { %1306 = dma.done.wait [#allocation6], 16416  }
  0x59   :  { %1307 = vsyncadd [#allocation6], 4294950880 }
  0x5a   :  { %1308 = dma.done.wait [#allocation9], 10240  }
  0x5b   :  { %1309 = vsyncadd [#allocation9], 4294957056  ;;  %v1323_v0 = vmov 0.0   ;;  %v101_v1 = vld [vmem:[#allocation2 + $0x8] sm:$0xff]  ;;  %v103_v2 = vld [vmem:[#allocation2 + $0x18] sm:$0xff]  ;;  %vm116_vm0 = vcmask 130048  }
  0x5c   :  { %184 = vmatprep.mubr.f32.mxu0 %v1323_v0  ;;  %v100_v3 = vld [vmem:[#allocation2] sm:$0xff]  ;;  %v937_v4 = vpack.c.bf16 %v103_v2, %v101_v1  ;;  %v102_v5 = vld [vmem:[#allocation2 + $0x10] sm:$0xff]  ;;  %vm1325_vm1 = vmmov 0   ;;  %s1326_s13 = smov [#allocation11]  }
  0x5d   :  { %v194_v6 = vld [vmem:[#allocation7 + $0x8] sm:$0xff]  ;;  %v939_v7 = vpack.c.bf16 %v102_v5, %v100_v3  ;;  %v99_v8 = vld [vmem:[%s1491_s0] sm:$0x3]  ;;  %v193_v14 = vld [vmem:[#allocation7] sm:$0xff]  ;;  %s801_s14 = sshll.u32 %s1326_s13, 4  ;;  %s802_s14 = int_to_ptr.vmem [resolvable:$true] %s801_s14 }
  0x5e   :  { %v198_v9 = vld [vmem:[#allocation7 + $0x28] sm:$0xff]  ;;  %v196_v10 = vld [vmem:[#allocation7 + $0x18] sm:$0xff]  ;;  %938 = vmatprep.subr.bf16.mxu0 %v937_v4  ;;  %v197_v15 = vld [vmem:[#allocation7 + $0x20] sm:$0xff]  ;;  %p1287_p13 = scmp.lt.s32.totalorder %s802_s14, %s802_s14 }
  0x5f   :  { %v200_v11 = vld [vmem:[#allocation7 + $0x38] sm:$0xff]  ;;  %v941_v12 = vpack.c.bf16 %v198_v9, %v194_v6  ;;  %v195_v16 = vld [vmem:[#allocation7 + $0x10] sm:$0xff]  ;;  %940 = vmatpush1.bf16.msra.mxu0 %v939_v7  ;;  %v943_v17 = vpack.c.bf16 %v197_v15, %v193_v14  ;;  %v202_v19 = vld [vmem:[#allocation7 + $0x48] sm:$0xff] }
  0x60   :  { %v1005_v13 = vpack.c.bf16 %v200_v11, %v196_v10  ;;  %v199_v18 = vld [vmem:[#allocation7 + $0x30] sm:$0xff]  ;;  %v206_v20 = vld [vmem:[#allocation7 + $0x68] sm:$0xff]  ;;  %v204_v23 = vld [vmem:[#allocation7 + $0x58] sm:$0xff] }
  0x61   :  { %942 = vmatprep.subr.bf16.mxu1 %v941_v12  ;;  %v1007_v21 = vpack.c.bf16 %v199_v18, %v195_v16  ;;  %v945_v22 = vpack.c.bf16 %v206_v20, %v202_v19  ;;  %v208_v24 = vld [vmem:[#allocation7 + $0x78] sm:$0xff]  ;;  %v201_v25 = vld [vmem:[#allocation7 + $0x40] sm:$0xff]  ;;  %v203_v28 = vld [vmem:[#allocation7 + $0x50] sm:$0xff] }
  0x62   :  { %1006 = vmatprep.subr.bf16.mxu0 %v1005_v13  ;;  %944 = vmatpush1.bf16.msra.mxu1 %v943_v17  ;;  %v1009_v26 = vpack.c.bf16 %v208_v24, %v204_v23  ;;  %v205_v27 = vld [vmem:[#allocation7 + $0x60] sm:$0xff]  ;;  %v207_v29 = vld [vmem:[#allocation7 + $0x70] sm:$0xff]  ;;  %v210_v31 = vld [vmem:[#allocation7 + $0x88] sm:$0xff] }
  0x63   :  { %812 = vmatmul.mubr.msk.f32.vlgmr.msra.gmra.mrb[0].mxu0 %vm116_vm0, %v99_v8  ;;  %946 = vmatprep.subr.bf16.mxu1 %v945_v22  ;;  %v947_v30 = vpack.c.bf16 %v205_v27, %v201_v25  ;;  %v214_v32 = vld [vmem:[#allocation7 + $0xa8] sm:$0xff]  ;;  %v212_v33 = vld [vmem:[#allocation7 + $0x98] sm:$0xff]  ;;  %v1011_v34 = vpack.c.bf16 %v207_v29, %v203_v28  ;;  %v209_v37 = vld [vmem:[#allocation7 + $0x80] sm:$0xff] }
  0x64   :  { %1008 = vmatpush1.bf16.msra.mxu0 %v1007_v21  ;;  %v949_v35 = vpack.c.bf16 %v214_v32, %v210_v31  ;;  %v216_v36 = vld [vmem:[#allocation7 + $0xb8] sm:$0xff]  ;;  %v213_v38 = vld [vmem:[#allocation7 + $0xa0] sm:$0xff]  ;;  %v211_v40 = vld [vmem:[#allocation7 + $0x90] sm:$0xff] }
  0x65   :  { %1010 = vmatprep.subr.bf16.mxu0 %v1009_v26  ;;  %v1013_v39 = vpack.c.bf16 %v216_v36, %v212_v33  ;;  %v215_v41 = vld [vmem:[#allocation7 + $0xb0] sm:$0xff]  ;;  %v218_v42 = vld [vmem:[#allocation7 + $0xc8] sm:$0xff]  ;;  %v951_v43 = vpack.c.bf16 %v213_v38, %v209_v37  ;;  %v220_v45 = vld [vmem:[#allocation7 + $0xd8] sm:$0xff] }
  0x66   :  { %948 = vmatpush1.bf16.msra.mxu1 %v947_v30  ;;  %v222_v44 = vld [vmem:[#allocation7 + $0xe8] sm:$0xff]  ;;  %v224_v46 = vld [vmem:[#allocation7 + $0xf8] sm:$0xff]  ;;  %v217_v48 = vld [vmem:[#allocation7 + $0xc0] sm:$0xff]  ;;  %v1015_v50 = vpack.c.bf16 %v215_v41, %v211_v40 }
  0x67   :  { %950 = vmatprep.subr.bf16.mxu1 %v949_v35  ;;  %v953_v47 = vpack.c.bf16 %v222_v44, %v218_v42  ;;  %v221_v49 = vld [vmem:[#allocation7 + $0xe0] sm:$0xff]  ;;  %v226_v51 = vld [vmem:[#allocation7 + $0x108] sm:$0xff]  ;;  %v1017_v53 = vpack.c.bf16 %v224_v46, %v220_v45  ;;  %v219_v54 = vld [vmem:[#allocation7 + $0xd0] sm:$0xff] }
  0x68   :  { %1012 = vmatpush1.bf16.msra.mxu0 %v1011_v34  ;;  %v230_v52 = vld [vmem:[#allocation7 + $0x128] sm:$0xff]  ;;  %v223_v55 = vld [vmem:[#allocation7 + $0xf0] sm:$0xff]  ;;  %v955_v56 = vpack.c.bf16 %v221_v49, %v217_v48  ;;  %v228_v57 = vld [vmem:[#allocation7 + $0x118] sm:$0xff] }
  0x69   :  { %1014 = vmatprep.subr.bf16.mxu0 %v1013_v39  ;;  %v232_v58 = vld [vmem:[#allocation7 + $0x138] sm:$0xff]  ;;  %v957_v59 = vpack.c.bf16 %v230_v52, %v226_v51  ;;  %v225_v60 = vld [vmem:[#allocation7 + $0x100] sm:$0xff]  ;;  %v1019_v62 = vpack.c.bf16 %v223_v55, %v219_v54  ;;  %v234_v63 = vld [vmem:[#allocation7 + $0x148] sm:$0xff] }
  0x6a   :  { %952 = vmatpush1.bf16.msra.mxu1 %v951_v43  ;;  %v229_v61 = vld [vmem:[#allocation7 + $0x120] sm:$0xff]  ;;  %v238_v1 = vld [vmem:[#allocation7 + $0x168] sm:$0xff]  ;;  %v1021_v2 = vpack.c.bf16 %v232_v58, %v228_v57  ;;  %v227_v3 = vld [vmem:[#allocation7 + $0x110] sm:$0xff] }
  0x6b   :  { %954 = vmatprep.subr.bf16.mxu1 %v953_v47  ;;  %v231_v4 = vld [vmem:[#allocation7 + $0x130] sm:$0xff]  ;;  %v959_v5 = vpack.c.bf16 %v229_v61, %v225_v60  ;;  %v236_v6 = vld [vmem:[#allocation7 + $0x158] sm:$0xff]  ;;  %v961_v8 = vpack.c.bf16 %v238_v1, %v234_v63  ;;  %v233_v9 = vld [vmem:[#allocation7 + $0x140] sm:$0xff] }
  0x6c   :  { %1016 = vmatpush1.bf16.msra.mxu0 %v1015_v50  ;;  %v240_v7 = vld [vmem:[#allocation7 + $0x178] sm:$0xff]  ;;  %v237_v10 = vld [vmem:[#allocation7 + $0x160] sm:$0xff]  ;;  %v1023_v11 = vpack.c.bf16 %v231_v4, %v227_v3  ;;  %v242_v12 = vld [vmem:[#allocation7 + $0x188] sm:$0xff] }
  0x6d   :  { %1018 = vmatprep.subr.bf16.mxu0 %v1017_v53  ;;  %v246_v13 = vld [vmem:[#allocation7 + $0x1a8] sm:$0xff]  ;;  %v1025_v14 = vpack.c.bf16 %v240_v7, %v236_v6  ;;  %v235_v15 = vld [vmem:[#allocation7 + $0x150] sm:$0xff]  ;;  %v963_v17 = vpack.c.bf16 %v237_v10, %v233_v9  ;;  %v244_v18 = vld [vmem:[#allocation7 + $0x198] sm:$0xff] }
  0x6e   :  { %956 = vmatpush1.bf16.msra.mxu1 %v955_v56  ;;  %v239_v16 = vld [vmem:[#allocation7 + $0x170] sm:$0xff]  ;;  %v248_v19 = vld [vmem:[#allocation7 + $0x1b8] sm:$0xff]  ;;  %v965_v20 = vpack.c.bf16 %v246_v13, %v242_v12  ;;  %v241_v21 = vld [vmem:[#allocation7 + $0x180] sm:$0xff] }
  0x6f   :  { %958 = vmatprep.subr.bf16.mxu1 %v957_v59  ;;  %v245_v22 = vld [vmem:[#allocation7 + $0x1a0] sm:$0xff]  ;;  %v1027_v23 = vpack.c.bf16 %v239_v16, %v235_v15  ;;  %v250_v24 = vld [vmem:[#allocation7 + $0x1c8] sm:$0xff]  ;;  %v1029_v26 = vpack.c.bf16 %v248_v19, %v244_v18  ;;  %v243_v27 = vld [vmem:[#allocation7 + $0x190] sm:$0xff] }
  0x70   :  { %1020 = vmatpush1.bf16.msra.mxu0 %v1019_v62  ;;  %v254_v25 = vld [vmem:[#allocation7 + $0x1e8] sm:$0xff]  ;;  %v247_v28 = vld [vmem:[#allocation7 + $0x1b0] sm:$0xff]  ;;  %v967_v29 = vpack.c.bf16 %v245_v22, %v241_v21  ;;  %v252_v30 = vld [vmem:[#allocation7 + $0x1d8] sm:$0xff] }
  0x71   :  { %1022 = vmatprep.subr.bf16.mxu0 %v1021_v2  ;;  %v256_v31 = vld [vmem:[#allocation7 + $0x1f8] sm:$0xff]  ;;  %v969_v32 = vpack.c.bf16 %v254_v25, %v250_v24  ;;  %v249_v33 = vld [vmem:[#allocation7 + $0x1c0] sm:$0xff]  ;;  %v1031_v35 = vpack.c.bf16 %v247_v28, %v243_v27  ;;  %v258_v36 = vld [vmem:[#allocation7 + $0x208] sm:$0xff] }
  0x72   :  { %960 = vmatpush1.bf16.msra.mxu1 %v959_v5  ;;  %v253_v34 = vld [vmem:[#allocation7 + $0x1e0] sm:$0xff]  ;;  %v262_v37 = vld [vmem:[#allocation7 + $0x228] sm:$0xff]  ;;  %v1033_v38 = vpack.c.bf16 %v256_v31, %v252_v30  ;;  %v251_v39 = vld [vmem:[#allocation7 + $0x1d0] sm:$0xff] }
  0x73   :  { %962 = vmatprep.subr.bf16.mxu1 %v961_v8  ;;  %v255_v40 = vld [vmem:[#allocation7 + $0x1f0] sm:$0xff]  ;;  %v971_v41 = vpack.c.bf16 %v253_v34, %v249_v33  ;;  %v260_v42 = vld [vmem:[#allocation7 + $0x218] sm:$0xff]  ;;  %v973_v44 = vpack.c.bf16 %v262_v37, %v258_v36  ;;  %v257_v45 = vld [vmem:[#allocation7 + $0x200] sm:$0xff] }
  0x74   :  { %1024 = vmatpush1.bf16.msra.mxu0 %v1023_v11  ;;  %v264_v43 = vld [vmem:[#allocation7 + $0x238] sm:$0xff]  ;;  %v261_v46 = vld [vmem:[#allocation7 + $0x220] sm:$0xff]  ;;  %v1035_v47 = vpack.c.bf16 %v255_v40, %v251_v39  ;;  %v266_v48 = vld [vmem:[#allocation7 + $0x248] sm:$0xff] }
  0x75   :  { %1026 = vmatprep.subr.bf16.mxu0 %v1025_v14  ;;  %v270_v49 = vld [vmem:[#allocation7 + $0x268] sm:$0xff]  ;;  %v1037_v50 = vpack.c.bf16 %v264_v43, %v260_v42  ;;  %v259_v51 = vld [vmem:[#allocation7 + $0x210] sm:$0xff]  ;;  %v975_v53 = vpack.c.bf16 %v261_v46, %v257_v45  ;;  %v268_v54 = vld [vmem:[#allocation7 + $0x258] sm:$0xff] }
  0x76   :  { %964 = vmatpush1.bf16.msra.mxu1 %v963_v17  ;;  %v263_v52 = vld [vmem:[#allocation7 + $0x230] sm:$0xff]  ;;  %v272_v55 = vld [vmem:[#allocation7 + $0x278] sm:$0xff]  ;;  %v977_v56 = vpack.c.bf16 %v270_v49, %v266_v48  ;;  %v265_v57 = vld [vmem:[#allocation7 + $0x240] sm:$0xff] }
  0x77   :  { %966 = vmatprep.subr.bf16.mxu1 %v965_v20  ;;  %v269_v58 = vld [vmem:[#allocation7 + $0x260] sm:$0xff]  ;;  %v1039_v59 = vpack.c.bf16 %v263_v52, %v259_v51  ;;  %v274_v60 = vld [vmem:[#allocation7 + $0x288] sm:$0xff]  ;;  %v1041_v62 = vpack.c.bf16 %v272_v55, %v268_v54  ;;  %v267_v63 = vld [vmem:[#allocation7 + $0x250] sm:$0xff] }
  0x78   :  { %1028 = vmatpush1.bf16.msra.mxu0 %v1027_v23  ;;  %v278_v61 = vld [vmem:[#allocation7 + $0x2a8] sm:$0xff]  ;;  %v271_v1 = vld [vmem:[#allocation7 + $0x270] sm:$0xff]  ;;  %v979_v2 = vpack.c.bf16 %v269_v58, %v265_v57  ;;  %v276_v3 = vld [vmem:[#allocation7 + $0x298] sm:$0xff] }
  0x79   :  { %1030 = vmatprep.subr.bf16.mxu0 %v1029_v26  ;;  %v280_v4 = vld [vmem:[#allocation7 + $0x2b8] sm:$0xff]  ;;  %v981_v5 = vpack.c.bf16 %v278_v61, %v274_v60  ;;  %v273_v6 = vld [vmem:[#allocation7 + $0x280] sm:$0xff]  ;;  %v1043_v8 = vpack.c.bf16 %v271_v1, %v267_v63  ;;  %v282_v9 = vld [vmem:[#allocation7 + $0x2c8] sm:$0xff] }
  0x7a   :  { %968 = vmatpush1.bf16.msra.mxu1 %v967_v29  ;;  %v277_v7 = vld [vmem:[#allocation7 + $0x2a0] sm:$0xff]  ;;  %v286_v10 = vld [vmem:[#allocation7 + $0x2e8] sm:$0xff]  ;;  %v1045_v11 = vpack.c.bf16 %v280_v4, %v276_v3  ;;  %v275_v12 = vld [vmem:[#allocation7 + $0x290] sm:$0xff] }
  0x7b   :  { %970 = vmatprep.subr.bf16.mxu1 %v969_v32  ;;  %v279_v13 = vld [vmem:[#allocation7 + $0x2b0] sm:$0xff]  ;;  %v983_v14 = vpack.c.bf16 %v277_v7, %v273_v6  ;;  %v284_v15 = vld [vmem:[#allocation7 + $0x2d8] sm:$0xff]  ;;  %v985_v17 = vpack.c.bf16 %v286_v10, %v282_v9  ;;  %v281_v18 = vld [vmem:[#allocation7 + $0x2c0] sm:$0xff] }
  0x7c   :  { %1032 = vmatpush1.bf16.msra.mxu0 %v1031_v35  ;;  %v288_v16 = vld [vmem:[#allocation7 + $0x2f8] sm:$0xff]  ;;  %v285_v19 = vld [vmem:[#allocation7 + $0x2e0] sm:$0xff]  ;;  %v1047_v20 = vpack.c.bf16 %v279_v13, %v275_v12  ;;  %v290_v21 = vld [vmem:[#allocation7 + $0x308] sm:$0xff] }
  0x7d   :  { %1034 = vmatprep.subr.bf16.mxu0 %v1033_v38  ;;  %v294_v22 = vld [vmem:[#allocation7 + $0x328] sm:$0xff]  ;;  %v1049_v23 = vpack.c.bf16 %v288_v16, %v284_v15  ;;  %v283_v24 = vld [vmem:[#allocation7 + $0x2d0] sm:$0xff]  ;;  %v987_v26 = vpack.c.bf16 %v285_v19, %v281_v18  ;;  %v292_v27 = vld [vmem:[#allocation7 + $0x318] sm:$0xff] }
  0x7e   :  { %972 = vmatpush1.bf16.msra.mxu1 %v971_v41  ;;  %v287_v25 = vld [vmem:[#allocation7 + $0x2f0] sm:$0xff]  ;;  %v296_v28 = vld [vmem:[#allocation7 + $0x338] sm:$0xff]  ;;  %v989_v29 = vpack.c.bf16 %v294_v22, %v290_v21  ;;  %v289_v30 = vld [vmem:[#allocation7 + $0x300] sm:$0xff] }
  0x7f   :  { %974 = vmatprep.subr.bf16.mxu1 %v973_v44  ;;  %v293_v31 = vld [vmem:[#allocation7 + $0x320] sm:$0xff]  ;;  %v1051_v32 = vpack.c.bf16 %v287_v25, %v283_v24  ;;  %v298_v33 = vld [vmem:[#allocation7 + $0x348] sm:$0xff]  ;;  %v1053_v35 = vpack.c.bf16 %v296_v28, %v292_v27  ;;  %v291_v36 = vld [vmem:[#allocation7 + $0x310] sm:$0xff] }
  0x80   :  { %1036 = vmatpush1.bf16.msra.mxu0 %v1035_v47  ;;  %v302_v34 = vld [vmem:[#allocation7 + $0x368] sm:$0xff]  ;;  %v295_v37 = vld [vmem:[#allocation7 + $0x330] sm:$0xff]  ;;  %v991_v38 = vpack.c.bf16 %v293_v31, %v289_v30  ;;  %v300_v39 = vld [vmem:[#allocation7 + $0x358] sm:$0xff] }
  0x81   :  { %1038 = vmatprep.subr.bf16.mxu0 %v1037_v50  ;;  %v304_v40 = vld [vmem:[#allocation7 + $0x378] sm:$0xff]  ;;  %v993_v41 = vpack.c.bf16 %v302_v34, %v298_v33  ;;  %v297_v42 = vld [vmem:[#allocation7 + $0x340] sm:$0xff]  ;;  %v1055_v44 = vpack.c.bf16 %v295_v37, %v291_v36  ;;  %v306_v45 = vld [vmem:[#allocation7 + $0x388] sm:$0xff] }
  0x82   :  { %976 = vmatpush1.bf16.msra.mxu1 %v975_v53  ;;  %v301_v43 = vld [vmem:[#allocation7 + $0x360] sm:$0xff]  ;;  %v310_v46 = vld [vmem:[#allocation7 + $0x3a8] sm:$0xff]  ;;  %v1057_v47 = vpack.c.bf16 %v304_v40, %v300_v39  ;;  %v299_v48 = vld [vmem:[#allocation7 + $0x350] sm:$0xff] }
  0x83   :  { %978 = vmatprep.subr.bf16.mxu1 %v977_v56  ;;  %v303_v49 = vld [vmem:[#allocation7 + $0x370] sm:$0xff]  ;;  %v995_v50 = vpack.c.bf16 %v301_v43, %v297_v42  ;;  %v308_v51 = vld [vmem:[#allocation7 + $0x398] sm:$0xff]  ;;  %v997_v53 = vpack.c.bf16 %v310_v46, %v306_v45  ;;  %v305_v56 = vld [vmem:[#allocation7 + $0x380] sm:$0xff] }
  0x84   :  { %1040 = vmatpush1.bf16.msra.mxu0 %v1039_v59  ;;  %v312_v52 = vld [vmem:[#allocation7 + $0x3b8] sm:$0xff]  ;;  %v1059_v54 = vpack.c.bf16 %v303_v49, %v299_v48  ;;  %v309_v57 = vld [vmem:[#allocation7 + $0x3a0] sm:$0xff]  ;;  %v307_v58 = vld [vmem:[#allocation7 + $0x390] sm:$0xff] }
  0x85   :  { %1042 = vmatprep.subr.bf16.mxu0 %v1041_v62  ;;  %v1061_v55 = vpack.c.bf16 %v312_v52, %v308_v51  ;;  %v999_v59 = vpack.c.bf16 %v309_v57, %v305_v56  ;;  %v311_v60 = vld [vmem:[#allocation7 + $0x3b0] sm:$0xff]  ;;  %v314_v62 = vld [vmem:[#allocation7 + $0x3c8] sm:$0xff]  ;;  %v316_v1 = vld [vmem:[#allocation7 + $0x3d8] sm:$0xff] }
  0x86   :  { %980 = vmatpush1.bf16.msra.mxu1 %v979_v2  ;;  %v1063_v61 = vpack.c.bf16 %v311_v60, %v307_v58  ;;  %v318_v63 = vld [vmem:[#allocation7 + $0x3e8] sm:$0xff]  ;;  %v320_v3 = vld [vmem:[#allocation7 + $0x3f8] sm:$0xff]  ;;  %v313_v4 = vld [vmem:[#allocation7 + $0x3c0] sm:$0xff] }
  0x87   :  { %982 = vmatprep.subr.bf16.mxu1 %v981_v5  ;;  %v1001_v2 = vpack.c.bf16 %v318_v63, %v314_v62  ;;  %v317_v5 = vld [vmem:[#allocation7 + $0x3e0] sm:$0xff]  ;;  %v1065_v6 = vpack.c.bf16 %v320_v3, %v316_v1  ;;  %v319_v9 = vld [vmem:[#allocation7 + $0x3f0] sm:$0xff]  ;;  %v506_v12 = vld [vmem:[#allocation8 + $0x88] sm:$0xff] }
  0x88   :  { %1044 = vmatpush1.bf16.msra.mxu0 %v1043_v8  ;;  %v1003_v7 = vpack.c.bf16 %v317_v5, %v313_v4  ;;  %v315_v8 = vld [vmem:[#allocation7 + $0x3d0] sm:$0xff]  ;;  %v537_v13 = vld [vmem:[#allocation8 + $0x180] sm:$0xff]  ;;  %v538_v15 = vld [vmem:[#allocation8 + $0x188] sm:$0xff] }
  0x89   :  { %1046 = vmatprep.subr.bf16.mxu0 %v1045_v11  ;;  %v1067_v10 = vpack.c.bf16 %v319_v9, %v315_v8  ;;  %v505_v11 = vld [vmem:[#allocation8 + $0x80] sm:$0xff]  ;;  %v1101_v16 = vpack.c.bf16 %v538_v15, %v537_v13  ;;  %v522_v30 = vld [vmem:[#allocation8 + $0x108] sm:$0xff]  ;;  %v507_v31 = vld [vmem:[#allocation8 + $0x90] sm:$0xff] }
  0x8a   :  { %984 = vmatpush1.bf16.msra.mxu1 %v983_v14  ;;  %v1069_v14 = vpack.c.bf16 %v506_v12, %v505_v11  ;;  %v489_v25 = vld [vmem:[#allocation8] sm:$0xff]  ;;  %v508_v33 = vld [vmem:[#allocation8 + $0x98] sm:$0xff]  ;;  %v539_v34 = vld [vmem:[#allocation8 + $0x190] sm:$0xff] }
  0x8b   :  { %986 = vmatprep.subr.bf16.mxu1 %v985_v17  ;;  %v106_v17 = vlaneseq  ;;  %v491_v39 = vld [vmem:[#allocation8 + $0x10] sm:$0xff]  ;;  %v492_v40 = vld [vmem:[#allocation8 + $0x18] sm:$0xff]  ;;  %v1073_v42 = vpack.c.bf16 %v508_v33, %v507_v31  ;;  %v509_v46 = vld [vmem:[#allocation8 + $0xa0] sm:$0xff] }
  0x8c   :  { %1048 = vmatpush1.bf16.msra.mxu0 %v1047_v20  ;;  %v104_v20 = vld [vmem:[#allocation5] sm:$0x3]  ;;  %v541_v48 = vld [vmem:[#allocation8 + $0x1a0] sm:$0xff]  ;;  %v542_v49 = vld [vmem:[#allocation8 + $0x1a8] sm:$0xff] }
  0x8d   :  { %1050 = vmatprep.subr.bf16.mxu0 %v1049_v23  ;;  %v1455_v18 = vshrl.u32 %v106_v17, 7  ;;  %v524_v45 = vld [vmem:[#allocation8 + $0x118] sm:$0xff]  ;;  %v493_v52 = vld [vmem:[#allocation8 + $0x20] sm:$0xff]  ;;  %v526_v57 = vld [vmem:[#allocation8 + $0x128] sm:$0xff] }
  0x8e   :  { %988 = vmatpush1.bf16.msra.mxu1 %v987_v26  ;;  %v490_v26 = vld [vmem:[#allocation8 + $0x8] sm:$0xff]  ;;  %v525_v56 = vld [vmem:[#allocation8 + $0x120] sm:$0xff]  ;;  %v511_v58 = vld [vmem:[#allocation8 + $0xb0] sm:$0xff] }
  0x8f   :  { %990 = vmatprep.subr.bf16.mxu1 %v989_v29  ;;  %v108_v19 = vsub.s32 0, %v1455_v18  ;;  %v112_v21 = vsub.s32 1, %v1455_v18  ;;  %v521_v29 = vld [vmem:[#allocation8 + $0x100] sm:$0xff]  ;;  %v1071_v37 = vpack.c.bf16 %v490_v26, %v489_v25  ;;  %v543_v60 = vld [vmem:[#allocation8 + $0x1b0] sm:$0xff]  ;;  %v1111_v63 = vpack.c.bf16 %v526_v57, %v525_v56  ;;  %v514_v8 = vld [vmem:[#allocation8 + $0xc8] sm:$0xff] }
  0x90   :  { %1052 = vmatpush1.bf16.msra.mxu0 %v1051_v32  ;;  %v495_v1 = vld [vmem:[#allocation8 + $0x30] sm:$0xff]  ;;  %v545_v9 = vld [vmem:[#allocation8 + $0x1c0] sm:$0xff]  ;;  %v548_v25 = vld [vmem:[#allocation8 + $0x1d8] sm:$0xff] }
  0x91   :  { %1054 = vmatprep.subr.bf16.mxu0 %v1053_v35  ;;  %v109_v22 = vrot.slane %v104_v20, %v108_v19  ;;  %v113_v23 = vrot.slane %v104_v20, %v112_v21  ;;  %v540_v35 = vld [vmem:[#allocation8 + $0x198] sm:$0xff]  ;;  %v527_v5 = vld [vmem:[#allocation8 + $0x130] sm:$0xff]  ;;  %v497_v13 = vld [vmem:[#allocation8 + $0x40] sm:$0xff] }
  0x92   :  { %992 = vmatpush1.bf16.msra.mxu1 %v991_v38  ;;  %v1103_v38 = vpack.c.bf16 %v522_v30, %v521_v29  ;;  %v1105_v43 = vpack.c.bf16 %v540_v35, %v539_v34  ;;  %v529_v17 = vld [vmem:[#allocation8 + $0x140] sm:$0xff]  ;;  %v530_v20 = vld [vmem:[#allocation8 + $0x148] sm:$0xff]  ;;  %v500_v29 = vld [vmem:[#allocation8 + $0x58] sm:$0xff] }
  0x93   :  { %994 = vmatprep.subr.bf16.mxu1 %v993_v41  ;;  %v532_v33 = vld [vmem:[#allocation8 + $0x158] sm:$0xff]  ;;  %v517_v34 = vld [vmem:[#allocation8 + $0xe0] sm:$0xff]  ;;  %v518_v35 = vld [vmem:[#allocation8 + $0xe8] sm:$0xff] }
  0x94   :  { %1056 = vmatpush1.bf16.msra.mxu0 %v1055_v44  ;;  %v523_v44 = vld [vmem:[#allocation8 + $0x110] sm:$0xff] }
  0x95   :  { %1058 = vmatprep.subr.bf16.mxu0 %v1057_v47  ;;  %v510_v47 = vld [vmem:[#allocation8 + $0xa8] sm:$0xff]  ;;  %v1107_v51 = vpack.c.bf16 %v524_v45, %v523_v44  ;;  %v533_v44 = vld [vmem:[#allocation8 + $0x160] sm:$0xff]  ;;  %v535_v57 = vld [vmem:[#allocation8 + $0x170] sm:$0xff] }
  0x96   :  { %996 = vmatpush1.bf16.msra.mxu1 %v995_v50  ;;  %v1075_v50 = vpack.c.bf16 %v492_v40, %v491_v39  ;;  %v1093_v40 = vpack.c.bf16 %v518_v35, %v517_v34  ;;  %v713_v35 = vld [vmem:[#allocation10 + $0x60] sm:$0xff] }
  0x97   :  { %998 = vmatprep.subr.bf16.mxu1 %v997_v53  ;;  %v494_v53 = vld [vmem:[#allocation8 + $0x28] sm:$0xff] }
  0x98   :  { %1060 = vmatpush1.bf16.msra.mxu0 %v1059_v54  ;;  %v1077_v54 = vpack.c.bf16 %v510_v47, %v509_v46  ;;  %v1079_v62 = vpack.c.bf16 %v494_v53, %v493_v52  ;;  %v534_v46 = vld [vmem:[#allocation8 + $0x168] sm:$0xff]  ;;  %v552_v52 = vld [vmem:[#allocation8 + $0x1f8] sm:$0xff]  ;;  %v503_v53 = vld [vmem:[#allocation8 + $0x70] sm:$0xff] }
  0x99   :  { %1062 = vmatprep.subr.bf16.mxu0 %v1061_v55  ;;  %v1109_v55 = vpack.c.bf16 %v542_v49, %v541_v48  ;;  %v1127_v47 = vpack.c.bf16 %v534_v46, %v533_v44  ;;  %v519_v48 = vld [vmem:[#allocation8 + $0xf0] sm:$0xff]  ;;  %v520_v49 = vld [vmem:[#allocation8 + $0xf8] sm:$0xff] }
  0x9a   :  { %1000 = vmatpush1.bf16.msra.mxu1 %v999_v59  ;;  %v512_v59 = vld [vmem:[#allocation8 + $0xb8] sm:$0xff] }
  0x9b   :  { %1002 = vmatprep.subr.bf16.mxu1 %v1001_v2  ;;  %v496_v2 = vld [vmem:[#allocation8 + $0x38] sm:$0xff]  ;;  %v1081_v3 = vpack.c.bf16 %v512_v59, %v511_v58 }
  0x9c   :  { %1064 = vmatpush1.bf16.msra.mxu0 %v1063_v61  ;;  %v544_v61 = vld [vmem:[#allocation8 + $0x1b8] sm:$0xff]  ;;  %v1083_v11 = vpack.c.bf16 %v496_v2, %v495_v1 }
  0x9d   :  { %1066 = vmatprep.subr.bf16.mxu0 %v1065_v6  ;;  %v1113_v4 = vpack.c.bf16 %v544_v61, %v543_v60  ;;  %v528_v6 = vld [vmem:[#allocation8 + $0x138] sm:$0xff]  ;;  %v1324_v60 = vmov 0.0|0.0   ;;  %v333_v61 = vsub.s32 2, %v1455_v18 }
  0x9e   :  { %1004 = vmatpush1.bf16.msra.mxu1 %v1003_v7  ;;  %v513_v7 = vld [vmem:[#allocation8 + $0xc0] sm:$0xff]  ;;  %v1115_v12 = vpack.c.bf16 %v528_v6, %v527_v5  ;;  %v536_v58 = vld [vmem:[#allocation8 + $0x178] sm:$0xff] }
  0x9f   :  { %1070 = vmatprep.subr.bf16.mxu1 %v1069_v14  ;;  %v498_v14 = vld [vmem:[#allocation8 + $0x48] sm:$0xff]  ;;  %v1085_v15 = vpack.c.bf16 %v514_v8, %v513_v7  ;;  %v1131_v59 = vpack.c.bf16 %v536_v58, %v535_v57 }
  0xa0   :  { %1068 = vmatpush1.bf16.msra.mxu0 %v1067_v10  ;;  %v546_v10 = vld [vmem:[#allocation8 + $0x1c8] sm:$0xff]  ;;  %v1087_v26 = vpack.c.bf16 %v498_v14, %v497_v13 }
  0xa1   :  { %1102 = vmatprep.subr.bf16.mxu0 %v1101_v16  ;;  %v1117_v16 = vpack.c.bf16 %v546_v10, %v545_v9 }
 0x136   :  { %v186_v24 = vpop.f32.mrb[0].mxu0 }
 0x137   :  { %v187_v27 = vadd.f32 %v186_v24, %v109_v22  ;;  %v188_v28 = vpop.f32.mrb[1].mxu0  ;;  %v515_v22 = vld [vmem:[#allocation8 + $0xd0] sm:$0xff] }
 0x138   :  { %v189_v32 = vadd.f32 %v188_v28, %v113_v23  ;;  %v516_v23 = vld [vmem:[#allocation8 + $0xd8] sm:$0xff]  ;;  %v547_v24 = vld [vmem:[#allocation8 + $0x1d0] sm:$0xff] }
 0x139   :  { %v191_v41 = vmax.f32 %v187_v27, 0.0  ;;  %v1119_v27 = vpack.c.bf16 %v530_v20, %v529_v17  ;;  %v499_v28 = vld [vmem:[#allocation8 + $0x50] sm:$0xff]  ;;  %v1089_v30 = vpack.c.bf16 %v516_v23, %v515_v22  ;;  %v1121_v31 = vpack.c.bf16 %v548_v25, %v547_v24  ;;  %v704_v23 = vld [vmem:[#allocation10 + $0x18] sm:$0xff]  ;;  %v706_v24 = vld [vmem:[#allocation10 + $0x28] sm:$0xff] }
 0x13a   :  { %v192_v36 = vmax.f32 %v189_v32, 0.0  ;;  %v531_v32 = vld [vmem:[#allocation8 + $0x150] sm:$0xff] }
 0x13b   :  { %v1123_v39 = vpack.c.bf16 %v532_v33, %v531_v32  ;;  %v703_v22 = vld [vmem:[#allocation10 + $0x10] sm:$0xff]  ;;  %v712_v33 = vld [vmem:[#allocation10 + $0x58] sm:$0xff] }
 0x13c   :  { %407 = vmatprep.mubr.f32.mxu1 %v192_v36  ;;  %478 = vmatprep.mubr.f32.mxu0 %v192_v36  ;;  %v549_v36 = vld [vmem:[#allocation8 + $0x1e0] sm:$0xff]  ;;  %v711_v32 = vld [vmem:[#allocation10 + $0x50] sm:$0xff] }
 0x13d   :  { %408 = vmatmul.mubr.f32.vlgmr.msra.gmra.mrb[0].mxu1 %v191_v41  ;;  %479 = vmatmul.mubr.f32.vlgmr.msra.gmra.mrb[2].mxu0 %v191_v41  ;;  %v1149_v34 = vpack.c.bf16 %v712_v33, %v711_v32 }
 0x13e   :  { %1072 = vmatpush3.bf16.msra.mxu1 %v1071_v37  ;;  %1104 = vmatpush3.bf16.msra.mxu0 %v1103_v38  ;;  %v550_v37 = vld [vmem:[#allocation8 + $0x1e8] sm:$0xff]  ;;  %v1091_v38 = vpack.c.bf16 %v500_v29, %v499_v28  ;;  %v709_v29 = vld [vmem:[#allocation10 + $0x40] sm:$0xff] }
 0x13f   :  { %1074 = vmatprep.subr.bf16.mxu1 %v1073_v42  ;;  %1106 = vmatprep.subr.bf16.mxu0 %v1105_v43  ;;  %v1125_v41 = vpack.c.bf16 %v550_v37, %v549_v36  ;;  %v501_v42 = vld [vmem:[#allocation8 + $0x60] sm:$0xff]  ;;  %v502_v43 = vld [vmem:[#allocation8 + $0x68] sm:$0xff] }
 0x140   :  { %v1095_v45 = vpack.c.bf16 %v502_v43, %v501_v42  ;;  %v714_v36 = vld [vmem:[#allocation10 + $0x68] sm:$0xff]  ;;  %v813_v43 = vld [vmem:[%s1497_s6] ss:$0 sm:$0xff]  ;;  %s1282_s6 = scalar_lea.vmem %s802_s14, 32 }
 0x141   :  { %v1152_v37 = vpack.c.bf16 %v714_v36, %v713_v35  ;;  %p1283_p12 = scmp.ne.s32.totalorder %s802_s14, %s1282_s6  ;;  %p1288_p0 = scmp.lt.s32.totalorder %s1282_s6, %s1282_s6 }
 0x142   :  { %1076 = vmatpush3.bf16.msra.mxu1 %v1075_v50  ;;  %1108 = vmatpush3.bf16.msra.mxu0 %v1107_v51  ;;  %v551_v50 = vld [vmem:[#allocation8 + $0x1f0] sm:$0xff]  ;;  %v1097_v51 = vpack.c.bf16 %v520_v49, %v519_v48 }
 0x143   :  { %1078 = vmatprep.subr.bf16.mxu1 %v1077_v54  ;;  %1110 = vmatprep.subr.bf16.mxu0 %v1109_v55  ;;  %v504_v54 = vld [vmem:[#allocation8 + $0x78] sm:$0xff]  ;;  %v1129_v55 = vpack.c.bf16 %v552_v52, %v551_v50  ;;  %p1289_p1 = por %p1288_p0, %p1287_p13 }
 0x144   :  { %v1099_v56 = vpack.c.bf16 %v504_v54, %v503_v53 }
 0x145   :  { %p1290_p2 = pnand %p1289_p1, %p1283_p12 }
 0x146   :  { %1080 = vmatpush3.bf16.msra.mxu1 %v1079_v62  ;;  %1112 = vmatpush3.bf16.msra.mxu0 %v1111_v63  ;;  %v321_v62 = vld [vmem:[%s1495_s4] sm:$0xf]  ;;  %v337_v63 = vsub.s32 3, %v1455_v18  ;;  %v1137_v18 = vpack.c.bf16 %v704_v23, %v703_v22 }
 0x147   :  { %1082 = vmatprep.subr.bf16.mxu1 %v1081_v3  ;;  %1114 = vmatprep.subr.bf16.mxu0 %v1113_v4  ;;  %v326_v1 = vrot.slane %v321_v62, %v108_v19  ;;  %v334_v2 = vrot.slane %v321_v62, %v333_v61  ;;  %v330_v3 = vrot.slane %v321_v62, %v112_v21  ;;  %v705_v21 = vld [vmem:[#allocation10 + $0x20] sm:$0xff] }
 0x148   :  { %v338_v4 = vrot.slane %v321_v62, %v337_v63  ;;  %v1140_v25 = vpack.c.bf16 %v706_v24, %v705_v21 }
 0x14a   :  { %1084 = vmatpush3.bf16.msra.mxu1 %v1083_v11  ;;  %1116 = vmatpush3.bf16.msra.mxu0 %v1115_v12  ;;  %v701_v11 = vld [vmem:[#allocation10] sm:$0xff]  ;;  %v702_v12 = vld [vmem:[#allocation10 + $0x8] sm:$0xff] }
 0x14b   :  { %1086 = vmatprep.subr.bf16.mxu1 %v1085_v15  ;;  %1118 = vmatprep.subr.bf16.mxu0 %v1117_v16  ;;  %v1134_v17 = vpack.c.bf16 %v702_v12, %v701_v11 }
 0x14e   :  { %1088 = vmatpush3.bf16.msra.mxu1 %v1087_v26  ;;  %1120 = vmatpush3.bf16.msra.mxu0 %v1119_v27  ;;  %v707_v26 = vld [vmem:[#allocation10 + $0x30] sm:$0xff]  ;;  %v708_v27 = vld [vmem:[#allocation10 + $0x38] sm:$0xff] }
 0x14f   :  { %1090 = vmatprep.subr.bf16.mxu1 %v1089_v30  ;;  %1122 = vmatprep.subr.bf16.mxu0 %v1121_v31  ;;  %v1143_v28 = vpack.c.bf16 %v708_v27, %v707_v26  ;;  %v710_v30 = vld [vmem:[#allocation10 + $0x48] sm:$0xff] }
 0x150   :  { %v1146_v31 = vpack.c.bf16 %v710_v30, %v709_v29 }
 0x152   :  { %1092 = vmatpush3.bf16.msra.mxu1 %v1091_v38  ;;  %1124 = vmatpush3.bf16.msra.mxu0 %v1123_v39  ;;  %v715_v38 = vld [vmem:[#allocation10 + $0x70] sm:$0xff]  ;;  %v716_v39 = vld [vmem:[#allocation10 + $0x78] sm:$0xff] }
 0x153   :  { %1094 = vmatprep.subr.bf16.mxu1 %v1093_v40  ;;  %1126 = vmatprep.subr.bf16.mxu0 %v1125_v41  ;;  %v1155_v40 = vpack.c.bf16 %v716_v39, %v715_v38 }
 0x156   :  { %1096 = vmatpush3.bf16.msra.mxu1 %v1095_v45  ;;  %1128 = vmatpush3.bf16.msra.mxu0 %v1127_v47 }
 0x157   :  { %1098 = vmatprep.subr.bf16.mxu1 %v1097_v51  ;;  %1130 = vmatprep.subr.bf16.mxu0 %v1129_v55  ;;  %v814_v51 = vld [vmem:[%s1499_s8] ss:$0 sm:$0xff] }
 0x15a   :  { %1100 = vmatpush3.bf16.msra.mxu1 %v1099_v56  ;;  %1132 = vmatpush3.bf16.msra.mxu0 %v1131_v59 }
 0x15b   :  { %1133 = vmatprep.subr.bf16.mxu1 %v1324_v60 }
 0x210   :  { %v409_v5 = vpop.f32.mrb[0].mxu1  ;;  %v480_v6 = vpop.f32.mrb[2].mxu0 }
 0x211   :  { %v410_v7 = vadd.f32 %v409_v5, %v326_v1  ;;  %v481_v8 = vadd.f32 %v480_v6, %v334_v2  ;;  %v411_v9 = vpop.f32.mrb[1].mxu1  ;;  %v482_v10 = vpop.f32.mrb[3].mxu0 }
 0x212   :  { %v412_v13 = vadd.f32 %v411_v9, %v330_v3  ;;  %v483_v14 = vadd.f32 %v482_v10, %v338_v4 }
 0x213   :  { %v485_v20 = vmax.f32 %v410_v7, 0.0  ;;  %v487_v19 = vmax.f32 %v481_v8, 0.0 }
 0x214   :  { %v486_v15 = vmax.f32 %v412_v13, 0.0  ;;  %v488_v16 = vmax.f32 %v483_v14, 0.0 }
 0x216   :  { %624 = vmatprep.mubr.f32.mxu1 %v486_v15  ;;  %694 = vmatprep.mubr.f32.mxu0 %v488_v16 }
 0x217   :  { %625 = vmatmul.mubr.f32.vlgmr.msra.gmra.mrb[2].mxu1 %v485_v20  ;;  %695 = vmatmul.mubr.f32.vlgmr.msra.gmra.mrb[4].mxu0 %v487_v19 }
 0x218   :  { %1135 = vmatpush3.bf16.msra.mxu1 %v1134_v17  ;;  %934 = vmatprep.mubr.msk.f32.mxu1 %vm1325_vm1, %v1323_v0 }
 0x219   :  { %1136 = vmatprep.subr.bf16.mxu1 %v1324_v60 }
 0x21c   :  { %1138 = vmatpush3.bf16.msra.mxu1 %v1137_v18 }
 0x21d   :  { %1139 = vmatprep.subr.bf16.mxu1 %v1324_v60 }
 0x220   :  { %1141 = vmatpush3.bf16.msra.mxu1 %v1140_v25 }
 0x221   :  { %1142 = vmatprep.subr.bf16.mxu1 %v1324_v60 }
 0x224   :  { %1144 = vmatpush3.bf16.msra.mxu1 %v1143_v28 }
 0x225   :  { %1145 = vmatprep.subr.bf16.mxu1 %v1324_v60 }
 0x228   :  { %1147 = vmatpush3.bf16.msra.mxu1 %v1146_v31 }
 0x229   :  { %1148 = vmatprep.subr.bf16.mxu1 %v1324_v60 }
 0x22c   :  { %1150 = vmatpush3.bf16.msra.mxu1 %v1149_v34 }
 0x22d   :  { %1151 = vmatprep.subr.bf16.mxu1 %v1324_v60 }
 0x230   :  { %1153 = vmatpush3.bf16.msra.mxu1 %v1152_v37 }
 0x231   :  { %1154 = vmatprep.subr.bf16.mxu1 %v1324_v60 }
 0x234   :  { %1156 = vmatpush3.bf16.msra.mxu1 %v1155_v40 }
 0x2ea   :  { %v847_v41 = vpop.f32.mrb[2].mxu1  ;;  %v882_v42 = vpop.f32.mrb[4].mxu0 }
 0x2eb   :  { %v848_v44 = vpop.f32.mrb[3].mxu1  ;;  %v883_v45 = vpop.f32.mrb[5].mxu0 }
 0x2ec   :  { %v849_v46 = vadd.f32 %v848_v44, %v847_v41  ;;  %v884_v47 = vadd.f32 %v883_v45, %v882_v42 }
 0x2ee   :  { %v627_v48 = vadd.f32 %v849_v46, %v813_v43 }
 0x2f0   :  { %v697_v49 = vadd.f32 %v884_v47, %v627_v48 }
 0x2f2   :  { %v700_v50 = vmax.f32 %v697_v49, 0.0 }
 0x2f4   :  { %935 = vmatmul.mubr.f32.vlgmr.msra.gmra.mrb[4].mxu1 %v700_v50 }
 0x3c7   :  { %v790_v0 = vpop.f32.mrb[4].mxu1 }
 0x3c8   :  { %v791_v52 = vadd.f32 %v814_v51, %v790_v0  ;;  %v936_v53 = vpop.f32.mrb[5].mxu1 }
 0x3ca   :  { %794 = vst [vmem:[#allocation11] sm:$0x3] %v791_v52 }
 0x3cb   :  { %1293 = shalt.err (!%p1290_p2)
}
 0x3cc   :  { %s1294_s1 = scalar_lea.hbm %s1500_s9, 32 }
 0x3cd   :  { %p1295_p3 = scmp.ne.s32.totalorder %s1500_s9, %s1294_s1  ;;  %p1298_p4 = scmp.lt.u32.totalorder %s1294_s1, %s1500_s9 }
 0x3cf   :  { %p1300_p5 = pnand %p1298_p4, %p1295_p3 }
 0x3d1   :  { %1303 = shalt.err (!%p1300_p5)
}
 0x3d2   :  { %804 = dma.vmem_to_hbm [thread:$0]  %s802_s14, 32, %s1500_s9, [#allocation4]  }
 0x3d3   :  { %1310 = dma.done.wait [#allocation4], 32  }
 0x3d4   :  { %1311 = vsyncadd [#allocation4], 4294967264 }
 0x3d5   :  { %808 = vsyncpa [#allocation3], 1 }
 0x3d6   :  { %809 = vsyncpa [#allocation6], 1 }
 0x3d7   :  { %810 = vsyncpa [#allocation9], 1 }
 0x3d8   :  { %811 = vsyncpa [#allocation4], 1 }

</bundles_post_ra>
